<compile_context>
chip_gen: v5e
topology: v5e:2x2
jax: 0.10.0
libtpu: 0.0.40
codegen_flags: <defaults>
</compile_context>

<pallas_src>
import functools

import jax
import jax.numpy as jnp
import numpy as np
from jax.experimental import pallas as pl
from jax.experimental.pallas import tpu as pltpu

_LANE = 128
_SUBLANE = 8


def _round_up(n, m):
    return ((n + m - 1) // m) * m


def _choose_block_b(batch, cap=256):
    """>=2 grid steps when possible (v7x 2-TC sharding), rows multiple of 8, <=cap."""
    if batch <= _SUBLANE:
        return _SUBLANE
    bb = min(cap, max(_SUBLANE, batch // 2))
    return max(_SUBLANE, (bb // _SUBLANE) * _SUBLANE)


def _dqn_mlp_kernel(x_ref, w1_ref, b1_ref, w2_ref, b2_ref,
                    w3_ref, b3_ref, wo_ref, bo_ref, o_ref):
    """Fused: relu(x@W1+b1) -> relu(@W2+b2) -> relu(@W3+b3) -> @Wout+bout."""
    x = x_ref[...]
    h = jnp.dot(x, w1_ref[...], preferred_element_type=jnp.float32) + b1_ref[...]
    h = jnp.maximum(h, 0.0).astype(w2_ref.dtype)
    h = jnp.dot(h, w2_ref[...], preferred_element_type=jnp.float32) + b2_ref[...]
    h = jnp.maximum(h, 0.0).astype(w3_ref.dtype)
    h = jnp.dot(h, w3_ref[...], preferred_element_type=jnp.float32) + b3_ref[...]
    h = jnp.maximum(h, 0.0).astype(wo_ref.dtype)
    out = jnp.dot(h, wo_ref[...], preferred_element_type=jnp.float32) + bo_ref[...]
    o_ref[...] = out.astype(o_ref.dtype)


@functools.partial(jax.jit, static_argnames=("block_b",))
def _dqn_forward_impl(x_pad, w1, b1, w2, b2, w3, b3, wo, bo, block_b):
    Bp, in_pad = x_pad.shape
    h_pad = w1.shape[1]
    out_pad = wo.shape[1]
    grid = (Bp // block_b,)

    def x_map(i):
        return (i, 0)

    def full_map(i):
        return (0, 0)

    flops = 2 * Bp * (in_pad * h_pad + 2 * h_pad * h_pad + h_pad * out_pad)
    bytes_accessed = (
        x_pad.size * x_pad.dtype.itemsize
        + sum(a.size * a.dtype.itemsize
              for a in (w1, b1, w2, b2, w3, b3, wo, bo))
        + Bp * out_pad * 4)

    in_specs = [
        pl.BlockSpec((block_b, in_pad), x_map),     # x tile (lane-dense)
        pl.BlockSpec((in_pad, h_pad), full_map),    # w1
        pl.BlockSpec((1, h_pad), full_map),         # b1
        pl.BlockSpec((h_pad, h_pad), full_map),     # w2
        pl.BlockSpec((1, h_pad), full_map),         # b2
        pl.BlockSpec((h_pad, h_pad), full_map),     # w3
        pl.BlockSpec((1, h_pad), full_map),         # b3
        pl.BlockSpec((h_pad, out_pad), full_map),   # wo (lane-padded)
        pl.BlockSpec((1, out_pad), full_map),       # bo
    ]
    out_spec = pl.BlockSpec((block_b, out_pad), x_map)  # lane-dense output

    return pl.pallas_call(
        _dqn_mlp_kernel,
        out_shape=jax.ShapeDtypeStruct((Bp, out_pad), jnp.float32),
        grid_spec=pl.GridSpec(grid=grid, in_specs=in_specs, out_specs=out_spec),
        compiler_params=pltpu.CompilerParams(
            dimension_semantics=("parallel",)),
        cost_estimate=pl.CostEstimate(
            flops=flops, transcendentals=0, bytes_accessed=bytes_accessed),
    )(x_pad, w1, b1, w2, b2, w3, b3, wo, bo)


def init_dqn_params(key, in_states, h1_nodes, out_actions):
    """Mirror nn.Linear's U(-1/sqrt(fan_in), 1/sqrt(fan_in)); weights stored (in, out)."""
    def linear(key, fan_in, fan_out):
        kw, kb = jax.random.split(key)
        bound = 1.0 / np.sqrt(fan_in)
        w = jax.random.uniform(kw, (fan_in, fan_out), jnp.float32, -bound, bound)
        b = jax.random.uniform(kb, (1, fan_out), jnp.float32, -bound, bound)
        return w, b

    k1, k2, k3, k4 = jax.random.split(key, 4)
    w1, b1 = linear(k1, in_states, h1_nodes)
    w2, b2 = linear(k2, h1_nodes, h1_nodes)
    w3, b3 = linear(k3, h1_nodes, h1_nodes)
    wo, bo = linear(k4, h1_nodes, out_actions)
    return dict(w1=w1, b1=b1, w2=w2, b2=b2, w3=w3, b3=b3, wo=wo, bo=bo)


def pad_dqn_params(params, compute_dtype=jnp.float32):
    """Zero-pad all dims to 128-lane multiples (done once); optional bf16 weights.

    Zero padding is exact: padded hidden columns stay 0 through ReLU and padded
    output columns are sliced off in the wrapper.
    """
    in_states, h1 = params["w1"].shape
    out_actions = params["wo"].shape[1]
    in_pad = _round_up(in_states, _LANE)
    h_pad = _round_up(h1, _LANE)
    out_pad = _round_up(out_actions, _LANE)

    def pad2(a, rows, cols):
        return jnp.pad(a, ((0, rows - a.shape[0]), (0, cols - a.shape[1])))

    padded = dict(
        w1=pad2(params["w1"], in_pad, h_pad).astype(compute_dtype),
        b1=pad2(params["b1"], 1, h_pad).astype(jnp.float32),
        w2=pad2(params["w2"], h_pad, h_pad).astype(compute_dtype),
        b2=pad2(params["b2"], 1, h_pad).astype(jnp.float32),
        w3=pad2(params["w3"], h_pad, h_pad).astype(compute_dtype),
        b3=pad2(params["b3"], 1, h_pad).astype(jnp.float32),
        wo=pad2(params["wo"], h_pad, out_pad).astype(compute_dtype),
        bo=pad2(params["bo"], 1, out_pad).astype(jnp.float32),
    )
    padded.update(in_states=in_states, out_actions=out_actions,
                  in_pad=in_pad, h_pad=h_pad, out_pad=out_pad,
                  compute_dtype=compute_dtype)
    return padded


def dqn_forward(x, padded_params, block_b=None):
    """x: (B, in_states) -> (B, out_actions). Uses pre-padded params."""
    B, in_states = x.shape
    assert in_states == padded_params["in_states"]
    in_pad = padded_params["in_pad"]
    out_actions = padded_params["out_actions"]
    cdt = padded_params["compute_dtype"]

    if block_b is None:
        block_b = _choose_block_b(B)
    Bp = _round_up(B, block_b)

    x_pad = jnp.pad(x, ((0, Bp - B), (0, in_pad - in_states))).astype(cdt)
    out = _dqn_forward_impl(
        x_pad,
        padded_params["w1"], padded_params["b1"],
        padded_params["w2"], padded_params["b2"],
        padded_params["w3"], padded_params["b3"],
        padded_params["wo"], padded_params["bo"],
        block_b)
    return out[:B, :out_actions]


def dqn_forward_ref(x, p):
    """Pure-JAX reference of the PyTorch forward (convolution=False)."""
    h = jax.nn.relu(x @ p["w1"] + p["b1"])
    h = jax.nn.relu(h @ p["w2"] + p["b2"])
    h = jax.nn.relu(h @ p["w3"] + p["b3"])
    return h @ p["wo"] + p["bo"]


if __name__ == "__main__":
    # Small shapes consistent with DQN(in_states, h1_nodes, out_actions)
    B, in_states, h1_nodes, out_actions = 16, 16, 32, 4

    key = jax.random.PRNGKey(0)
    kx, kp = jax.random.split(key)
    x = jax.random.normal(kx, (B, in_states), dtype=jnp.float32)
    params = init_dqn_params(kp, in_states, h1_nodes, out_actions)
    ref = dqn_forward_ref(x, params)

    # f32 path (exact against reference). block_b auto -> 8 rows x 2 grid steps
    # so a v7x chip shards the batch across both TensorCores.
    padded_f32 = pad_dqn_params(params, compute_dtype=jnp.float32)
    out_f32 = jax.block_until_ready(dqn_forward(x, padded_f32))
    np.testing.assert_allclose(np.asarray(out_f32), np.asarray(ref),
                               rtol=1e-5, atol=1e-5)

    # bf16 weight/input path (v6e/v7x bandwidth win), f32 MXU accumulation.
    padded_bf16 = pad_dqn_params(params, compute_dtype=jnp.bfloat16)
    out_bf16 = jax.block_until_ready(dqn_forward(x, padded_bf16))
    np.testing.assert_allclose(np.asarray(out_bf16), np.asarray(ref),
                               rtol=1e-1, atol=1e-1)

    print("KERNEL_OK")
</pallas_src>

<mosaic_0001>
module attributes {stable_mosaic.version = 11 : i64} {
  func.func @_dqn_mlp_kernel(%arg0: i32, %arg1: memref<8x128xf32, #tpu.memory_space<vmem>>, %arg2: memref<128x128xf32, #tpu.memory_space<vmem>>, %arg3: memref<1x128xf32, #tpu.memory_space<vmem>>, %arg4: memref<128x128xf32, #tpu.memory_space<vmem>>, %arg5: memref<1x128xf32, #tpu.memory_space<vmem>>, %arg6: memref<128x128xf32, #tpu.memory_space<vmem>>, %arg7: memref<1x128xf32, #tpu.memory_space<vmem>>, %arg8: memref<128x128xf32, #tpu.memory_space<vmem>>, %arg9: memref<1x128xf32, #tpu.memory_space<vmem>>, %arg10: memref<8x128xf32, #tpu.memory_space<vmem>>) attributes {dimension_semantics = [#tpu.dimension_semantics<parallel>], iteration_bounds = array<i64: 2>, scalar_prefetch = 0 : i64, scratch_operands = 0 : i64, tpu.core_type = #tpu.core_type<tc>, window_params = [{transform_indices = @transform_0, window_bounds = array<i64: 8, 128>}, {pipeline_mode = #tpu.pipeline_mode<synchronous>, transform_indices = @transform_1, window_bounds = array<i64: 128, 128>}, {pipeline_mode = #tpu.pipeline_mode<synchronous>, transform_indices = @transform_2, window_bounds = array<i64: 1, 128>}, {pipeline_mode = #tpu.pipeline_mode<synchronous>, transform_indices = @transform_3, window_bounds = array<i64: 128, 128>}, {pipeline_mode = #tpu.pipeline_mode<synchronous>, transform_indices = @transform_4, window_bounds = array<i64: 1, 128>}, {pipeline_mode = #tpu.pipeline_mode<synchronous>, transform_indices = @transform_5, window_bounds = array<i64: 128, 128>}, {pipeline_mode = #tpu.pipeline_mode<synchronous>, transform_indices = @transform_6, window_bounds = array<i64: 1, 128>}, {pipeline_mode = #tpu.pipeline_mode<synchronous>, transform_indices = @transform_7, window_bounds = array<i64: 128, 128>}, {pipeline_mode = #tpu.pipeline_mode<synchronous>, transform_indices = @transform_8, window_bounds = array<i64: 1, 128>}, {transform_indices = @transform_9, window_bounds = array<i64: 8, 128>}]} {
    %c0 = arith.constant 0 : index
    %c0_0 = arith.constant 0 : index
    %0 = vector.load %arg1[%c0, %c0_0] : memref<8x128xf32, #tpu.memory_space<vmem>>, vector<8x128xf32>
    %c0_1 = arith.constant 0 : index
    %c0_2 = arith.constant 0 : index
    %1 = vector.load %arg2[%c0_1, %c0_2] : memref<128x128xf32, #tpu.memory_space<vmem>>, vector<128x128xf32>
    %cst = arith.constant dense<0.000000e+00> : vector<8x128xf32>
    %2 = tpu.matmul %0, %1, %cst {dimension_numbers = #tpu.dot_dimension_numbers<[1], [0], [0], [1], [0, 0, 1, 1], [], []>} : vector<8x128xf32>, vector<128x128xf32>, vector<8x128xf32> -> vector<8x128xf32>
    %c0_3 = arith.constant 0 : index
    %c0_4 = arith.constant 0 : index
    %3 = vector.load %arg3[%c0_3, %c0_4] : memref<1x128xf32, #tpu.memory_space<vmem>>, vector<1x128xf32>
    %4 = vector.broadcast %3 : vector<1x128xf32> to vector<8x128xf32>
    %5 = arith.addf %2, %4 : vector<8x128xf32>
    %cst_5 = arith.constant 0.000000e+00 : f32
    %6 = vector.broadcast %cst_5 : f32 to vector<8x128xf32>
    %7 = arith.maximumf %5, %6 : vector<8x128xf32>
    %c0_6 = arith.constant 0 : index
    %c0_7 = arith.constant 0 : index
    %8 = vector.load %arg4[%c0_6, %c0_7] : memref<128x128xf32, #tpu.memory_space<vmem>>, vector<128x128xf32>
    %cst_8 = arith.constant dense<0.000000e+00> : vector<8x128xf32>
    %9 = tpu.matmul %7, %8, %cst_8 {dimension_numbers = #tpu.dot_dimension_numbers<[1], [0], [0], [1], [0, 0, 1, 1], [], []>} : vector<8x128xf32>, vector<128x128xf32>, vector<8x128xf32> -> vector<8x128xf32>
    %c0_9 = arith.constant 0 : index
    %c0_10 = arith.constant 0 : index
    %10 = vector.load %arg5[%c0_9, %c0_10] : memref<1x128xf32, #tpu.memory_space<vmem>>, vector<1x128xf32>
    %11 = vector.broadcast %10 : vector<1x128xf32> to vector<8x128xf32>
    %12 = arith.addf %9, %11 : vector<8x128xf32>
    %cst_11 = arith.constant 0.000000e+00 : f32
    %13 = vector.broadcast %cst_11 : f32 to vector<8x128xf32>
    %14 = arith.maximumf %12, %13 : vector<8x128xf32>
    %c0_12 = arith.constant 0 : index
    %c0_13 = arith.constant 0 : index
    %15 = vector.load %arg6[%c0_12, %c0_13] : memref<128x128xf32, #tpu.memory_space<vmem>>, vector<128x128xf32>
    %cst_14 = arith.constant dense<0.000000e+00> : vector<8x128xf32>
    %16 = tpu.matmul %14, %15, %cst_14 {dimension_numbers = #tpu.dot_dimension_numbers<[1], [0], [0], [1], [0, 0, 1, 1], [], []>} : vector<8x128xf32>, vector<128x128xf32>, vector<8x128xf32> -> vector<8x128xf32>
    %c0_15 = arith.constant 0 : index
    %c0_16 = arith.constant 0 : index
    %17 = vector.load %arg7[%c0_15, %c0_16] : memref<1x128xf32, #tpu.memory_space<vmem>>, vector<1x128xf32>
    %18 = vector.broadcast %17 : vector<1x128xf32> to vector<8x128xf32>
    %19 = arith.addf %16, %18 : vector<8x128xf32>
    %cst_17 = arith.constant 0.000000e+00 : f32
    %20 = vector.broadcast %cst_17 : f32 to vector<8x128xf32>
    %21 = arith.maximumf %19, %20 : vector<8x128xf32>
    %c0_18 = arith.constant 0 : index
    %c0_19 = arith.constant 0 : index
    %22 = vector.load %arg8[%c0_18, %c0_19] : memref<128x128xf32, #tpu.memory_space<vmem>>, vector<128x128xf32>
    %cst_20 = arith.constant dense<0.000000e+00> : vector<8x128xf32>
    %23 = tpu.matmul %21, %22, %cst_20 {dimension_numbers = #tpu.dot_dimension_numbers<[1], [0], [0], [1], [0, 0, 1, 1], [], []>} : vector<8x128xf32>, vector<128x128xf32>, vector<8x128xf32> -> vector<8x128xf32>
    %c0_21 = arith.constant 0 : index
    %c0_22 = arith.constant 0 : index
    %24 = vector.load %arg9[%c0_21, %c0_22] : memref<1x128xf32, #tpu.memory_space<vmem>>, vector<1x128xf32>
    %25 = vector.broadcast %24 : vector<1x128xf32> to vector<8x128xf32>
    %26 = arith.addf %23, %25 : vector<8x128xf32>
    %c0_23 = arith.constant 0 : index
    %c0_24 = arith.constant 0 : index
    %27 = vector.load %arg10[%c0_23, %c0_24] : memref<8x128xf32, #tpu.memory_space<vmem>>, vector<8x128xf32>
    tpu.vector_store %arg10[%c0_23, %c0_24], %26 {strides = array<i32>} : memref<8x128xf32, #tpu.memory_space<vmem>>, vector<8x128xf32>,
    return
  }
  func.func @transform_0(%arg0: i32) -> (i32, i32) {
    %c0_i32 = arith.constant 0 : i32
    %c0_i32_0 = arith.constant 0 : i32
    return %arg0, %c0_i32 : i32, i32
  }
  func.func @transform_1(%arg0: i32) -> (i32, i32) {
    %c0_i32 = arith.constant 0 : i32
    %c0_i32_0 = arith.constant 0 : i32
    %c0_i32_1 = arith.constant 0 : i32
    return %c0_i32, %c0_i32_0 : i32, i32
  }
  func.func @transform_2(%arg0: i32) -> (i32, i32) {
    %c0_i32 = arith.constant 0 : i32
    %c0_i32_0 = arith.constant 0 : i32
    %c0_i32_1 = arith.constant 0 : i32
    return %c0_i32, %c0_i32_0 : i32, i32
  }
  func.func @transform_3(%arg0: i32) -> (i32, i32) {
    %c0_i32 = arith.constant 0 : i32
    %c0_i32_0 = arith.constant 0 : i32
    %c0_i32_1 = arith.constant 0 : i32
    return %c0_i32, %c0_i32_0 : i32, i32
  }
  func.func @transform_4(%arg0: i32) -> (i32, i32) {
    %c0_i32 = arith.constant 0 : i32
    %c0_i32_0 = arith.constant 0 : i32
    %c0_i32_1 = arith.constant 0 : i32
    return %c0_i32, %c0_i32_0 : i32, i32
  }
  func.func @transform_5(%arg0: i32) -> (i32, i32) {
    %c0_i32 = arith.constant 0 : i32
    %c0_i32_0 = arith.constant 0 : i32
    %c0_i32_1 = arith.constant 0 : i32
    return %c0_i32, %c0_i32_0 : i32, i32
  }
  func.func @transform_6(%arg0: i32) -> (i32, i32) {
    %c0_i32 = arith.constant 0 : i32
    %c0_i32_0 = arith.constant 0 : i32
    %c0_i32_1 = arith.constant 0 : i32
    return %c0_i32, %c0_i32_0 : i32, i32
  }
  func.func @transform_7(%arg0: i32) -> (i32, i32) {
    %c0_i32 = arith.constant 0 : i32
    %c0_i32_0 = arith.constant 0 : i32
    %c0_i32_1 = arith.constant 0 : i32
    return %c0_i32, %c0_i32_0 : i32, i32
  }
  func.func @transform_8(%arg0: i32) -> (i32, i32) {
    %c0_i32 = arith.constant 0 : i32
    %c0_i32_0 = arith.constant 0 : i32
    %c0_i32_1 = arith.constant 0 : i32
    return %c0_i32, %c0_i32_0 : i32, i32
  }
  func.func @transform_9(%arg0: i32) -> (i32, i32) {
    %c0_i32 = arith.constant 0 : i32
    %c0_i32_0 = arith.constant 0 : i32
    return %arg0, %c0_i32 : i32, i32
  }
}

</mosaic_0001>

<bundles_post_ra>
// kernel: _dqn_forward_impl.1
= control target key start
LH: loop header
LB: loop body
LE: loop exit
PB: predicated region body
PF: predicated region fallthrough
CT: control target
= control target key end

     0   :  { %s1286_s0 = inlined_call_operand.hbm [shape: f32[16,128], index: 0, kind: input, shape index: {}]   ;;  %s1287_s1 = inlined_call_operand.hbm [shape: f32[128,128], index: 1, kind: input, shape index: {}]   ;;  %s1288_s2 = inlined_call_operand.vmem [shape: f32[1,128], index: 2, kind: input, shape index: {}]   ;;  %s1289_s3 = inlined_call_operand.hbm [shape: f32[128,128], index: 3, kind: input, shape index: {}]   ;;  %s1290_s4 = inlined_call_operand.vmem [shape: f32[1,128], index: 4, kind: input, shape index: {}]   ;;  %s1291_s5 = inlined_call_operand.hbm [shape: f32[128,128], index: 5, kind: input, shape index: {}]   ;;  %s1292_s6 = inlined_call_operand.vmem [shape: f32[1,128], index: 6, kind: input, shape index: {}]   ;;  %s1293_s7 = inlined_call_operand.hbm [shape: f32[128,128], index: 7, kind: input, shape index: {}]   ;;  %s1294_s8 = inlined_call_operand.vmem [shape: f32[1,128], index: 8, kind: input, shape index: {}]   ;;  %s1295_s9 = inlined_call_operand.hbm [shape: f32[16,128], index: 9, kind: output, shape index: {}]  }
   0x1   :  { %1296 = sst [smem:[#allocation16_spill]] %s1287_s1 }
   0x2   :  { %1297 = sst [smem:[#allocation17_spill]] %s1289_s3 }
   0x3   :  { %1298 = sst [smem:[#allocation18_spill]] %s1291_s5 }
   0x4   :  { %1299 = sst [smem:[#allocation19_spill]] %s1293_s7 }
   0x5   :  { %14 = vsyncpa [#allocation3], 0 }
   0x6   :  { %16 = vsyncpa [#allocation3 + $0x1], 0 }
   0x7   :  { %17 = vsyncpa [#allocation6], 0 }
   0x8   :  { %18 = vsyncpa [#allocation9], 0 }
   0x9   :  { %19 = vsyncpa [#allocation4], 0 }
   0xa   :  { %21 = vsyncpa [#allocation4 + $0x1], 0  ;;  %s1100_s30 = smov 0   ;;  %s1102_s10 = smov 0  }
   0xb   :  { %s1104_s11 = smov 0   ;;  %s1106_s12 = smov 0  }
   0xc LB: > { %s1300_s1 = sld [smem:[#allocation16_spill]]  ;;  %s1124_s16 = sadd.s32 4294967295, %s1042_s12   ;;  %s1042_s12 = sphi %s1106_s12, %s1315_s12   ;;  %s1038_s11 = sphi %s1104_s11, %s1314_s11   ;;  %s1034_s10 = sphi %s1102_s10, %s1313_s10   ;;  %s1030_s30 = sphi %s1100_s30, %s1312_s30  }
   0xd   : > { %p706_p0 = scmp.ge.s32.totalorder %s1042_s12, 1  ;;  %p48_p1 = scmp.eq.s32.totalorder %s1124_s16, 0 }
   0xe   : > { %p252_p2 = scmp.lt.s32.totalorder %s1042_s12, 3  ;;  %s1044_s18 = smov [#allocation5]  }
   0xf   : > { %s265_s19 = sshll.u32 %s1044_s18, 4  ;;  %s1302_s5 = sld [smem:[#allocation18_spill]]  ;;  %s266_s19 = int_to_ptr.vmem [resolvable:$true] %s265_s19 }
  0x10   : > { %p1129_p3 = pnand %p706_p0, %p252_p2  ;;  %s1304_s3 = sld [smem:[#allocation17_spill]] }
  0x11   : > { %s1045_s27 = smov [#allocation8]   ;;  %s1046_s29 = smov 128  }
  0x12   : > { %s263_s15 = sshll.u32 %s1300_s1, 4  ;;  %p745_p4 = pneg %p1129_p3  ;;  %s264_s15 = int_to_ptr.hbm [resolvable:$true] %s263_s15 }
  0x13   : > { %s299_s28 = sshll.u32 %s1045_s27, 4  ;;  %s1047_s13 = smov 8   ;;  %s300_s28 = int_to_ptr.vmem [resolvable:$true] %s299_s28 }
  0x14   : > { %p1141_p6 = pnand %p745_p4, %p48_p1  ;;  %s1305_s7 = sld [smem:[#allocation19_spill]] }
  0x15   : > { %s297_s22 = sshll.u32 %s1302_s5, 4  ;;  %s1048_s21 = smov [#allocation7]   ;;  %s298_s22 = int_to_ptr.hbm [resolvable:$true] %s297_s22 }
  0x16   : > { %s280_s26 = sshll.u32 %s1304_s3, 4  ;;  %s282_s24 = sshll.u32 %s1048_s21, 4  ;;  %s281_s26 = int_to_ptr.hbm [resolvable:$true] %s280_s26  ;;  %s283_s24 = int_to_ptr.vmem [resolvable:$true] %s282_s24 }
  0x17   : > { %748 = dma.hbm_to_vmem [thread:$0]  (!%p1141_p6), %s264_s15, 2048, %s266_s19, [#allocation6], %s1046_s29, %s1046_s29, %s1047_s13  }
  0x18   : > { %754 = dma.hbm_to_vmem [thread:$0]  (!%p1141_p6), %s298_s22, 2048, %s300_s28, [#allocation9], %s1046_s29, %s1046_s29, %s1047_s13  }
  0x19   : > { %751 = dma.hbm_to_vmem [thread:$0]  (!%p1141_p6), %s281_s26, 2048, %s283_s24, [#allocation6], %s1046_s29, %s1046_s29, %s1047_s13  }
  0x1a   : > { %s314_s20 = sshll.u32 %s1305_s7, 4  ;;  %s1049_s15 = smov [#allocation10]   ;;  %s315_s20 = int_to_ptr.hbm [resolvable:$true] %s314_s20 }
  0x1b   : > { %s316_s19 = sshll.u32 %s1049_s15, 4  ;;  %s705_s22 = sadd.s32 4294967294, %s1042_s12   ;;  %s317_s19 = int_to_ptr.vmem [resolvable:$true] %s316_s19 }
  0x1c   : > { %757 = dma.hbm_to_vmem [thread:$0]  (!%p1141_p6), %s315_s20, 2048, %s317_s19, [#allocation9], %s1046_s29, %s1046_s29, %s1047_s13  }
  0x1d   : > { %s1161_s25 = sadd.s32 1, %s1042_s12   ;;  %s34_s28 = sadd.s32 1, %s1038_s11 }
  0x1e   : > { %s31_s27 = ssub.s32 %s1042_s12, %s1161_s25  ;;  %p41_p8 = scmp.ne.s32.totalorder %s1038_s11, %s1034_s10 }
  0x1f   : > { %p32_p7 = scmp.eq.s32.totalorder %s31_s27, 0  ;;  %p42_p9 = scmp.eq.s32.totalorder %s1042_s12, 0 }
  0x20   : > { %p47_p10 = scmp.ne.s32.totalorder %s1034_s10, %s1030_s30  ;;  %p239_p13 = scmp.eq.s32.totalorder %s1124_s16, 1 }
  0x21   : > { %s1172_s26 = scalar_select %p32_p7, %s1038_s11, %s34_s28  }
  0x22   : > { %p1174_p11 = por %p42_p9, %p41_p8  ;;  %p1180_p12 = por %p48_p1, %p47_p10 }
  0x23   : > { %p245_p0 = scmp.eq.s32.totalorder %s705_s22, 1  ;;  %p770_p2 = scmp.lt.s32.totalorder %s1042_s12, 2 }
  0x24   : > { %s333_s29 = sand.u32 1, %s1038_s11   ;;  %p1187_p4 = por %p239_p13, %p41_p8 }
  0x25   : > { %p1191_p6 = por %p245_p0, %p47_p10  ;;  %s712_s20 = sshll.u32 %s333_s29, 3 }
  0x26   : > { %s713_s21 = sshll.u32 %s1042_s12, 3  ;;  %s337_s27 = scalar_lea.vmem [#allocation2], %s712_s20 }
  0x27   : > { %s341_s19 = scalar_lea.hbm %s1286_s0, %s713_s21  ;;  %s345_s28 = sshll.u32 %s337_s27, 4  ;;  %s346_s28 = int_to_ptr.vmem [resolvable:$true] %s345_s28 }
  0x28   : > { %s343_s1 = sshll.u32 %s341_s19, 4  ;;  %p1201_p7 = pnand %p770_p2, %p1174_p11  ;;  %s344_s1 = int_to_ptr.hbm [resolvable:$true] %s343_s1 }
  0x29   : > { %s334_s3 = scalar_lea.sflag [#allocation3], %s333_s29  ;;  %s938_s5 = sshra.s32 %s344_s1, 4  ;;  %s939_s5 = int_to_ptr.hbm [resolvable:$true] %s938_s5 }
  0x2a   : > { %s940_s7 = scalar_lea.hbm %s939_s5, 8  ;;  %p942_p9 = pneg %p1201_p7 }
  0x2b   : > { %p941_p8 = scmp.ne.s32.totalorder %s939_s5, %s940_s7  ;;  %s945_s24 = scalar_lea.hbm %s1286_s0, 16 }
  0x2c   : > { %p946_p11 = scmp.lt.s32.totalorder %s939_s5, %s1286_s0  ;;  %p947_p0 = scmp.lt.s32.totalorder %s945_s24, %s940_s7 }
  0x2d   : > { %p943_p10 = pnand %p942_p9, %p941_p8 }
  0x2e   : > { %p948_p2 = por %p947_p0, %p946_p11 }
  0x2f   : > { %p944_p13 = pneg %p943_p10 }
  0x31   : > { %p949_p5 = pnand %p948_p2, %p944_p13 }
  0x33   : > { %952 = shalt.err (!%p949_p5)
}
  0x34   : > { %761 = dma.hbm_to_vmem [thread:$0]  (!%p1201_p7), %s344_s1, 128, %s346_s28, %s334_s3  }
  0x35   : > { %354 = sbr.rel (%p1129_p3) target bundleno = 628 (0x274), region = 56  ;;  %s1218_s29 = sand.u32 (!%p1129_p3), 1, %s1034_s10  }
  0x36   : > { %s715_s19 = sshll.u32 (!%p1129_p3), %s1218_s29, 3  ;;  %s357_s27 = scalar_lea.sflag (!%p1129_p3), [#allocation3], %s1218_s29 }
  0x37   : > { %s1224_s5 = scalar_lea.vmem (!%p1129_p3), [#allocation2], %s715_s19 }
  0x3a   : > { %1013 = dma.done.wait (%p1180_p12), %s357_s27, 128  }
  0x3b   : > { %1015 = vsyncadd (%p1180_p12), %s357_s27, 4294967168 }
  0x3c   : > { %1017 = dma.done.wait (%p48_p1), [#allocation6], 4096  }
  0x3d   : > { %1019 = vsyncadd (%p48_p1), [#allocation6], 4294963200 }
  0x3e   : > { %1021 = dma.done.wait (%p48_p1), [#allocation9], 4096  }
  0x3f   : > { %1023 = vsyncadd (%p48_p1), [#allocation9], 4294963200  ;;  %v432_v0 = vld [vmem:[#allocation5 + $0x78] sm:$0xff]  ;;  %v431_v1 = vld [vmem:[#allocation5 + $0x70] sm:$0xff]  ;;  %s722_s22 = sshll.u32 %s1124_s16, 3  ;;  %s415_s27 = scalar_lea.vmem [#allocation11], %s715_s19 }
  0x40   : > { %437 = vmatpush.msra.mxu0 %v432_v0  ;;  %v430_v2 = vld [vmem:[#allocation5 + $0x68] sm:$0xff]  ;;  %v429_v3 = vld [vmem:[#allocation5 + $0x60] sm:$0xff]  ;;  %v473_v4 = vld [vmem:[#allocation7 + $0x78] sm:$0xff]  ;;  %s592_s24 = scalar_lea.hbm %s1295_s9, %s722_s22  ;;  %s582_s3 = scalar_lea.sflag [#allocation4], %s1218_s29 }
  0x41   : > { %v428_v5 = vld [vmem:[#allocation5 + $0x58] sm:$0xff]  ;;  %478 = vmatpush.msra.mxu1 %v473_v4  ;;  %v472_v6 = vld [vmem:[#allocation7 + $0x70] sm:$0xff]  ;;  %v471_v7 = vld [vmem:[#allocation7 + $0x68] sm:$0xff]  ;;  %s596_s1 = sshll.u32 %s592_s24, 4  ;;  %s988_s28 = scalar_lea.hbm %s1295_s9, 16  ;;  %s597_s1 = int_to_ptr.hbm [resolvable:$true] %s596_s1 }
  0x42   : > { %438 = vmatpush.msra.mxu0 %v431_v1  ;;  %v427_v8 = vld [vmem:[#allocation5 + $0x50] sm:$0xff]  ;;  %v470_v9 = vld [vmem:[#allocation7 + $0x60] sm:$0xff]  ;;  %v426_v10 = vld [vmem:[#allocation5 + $0x48] sm:$0xff]  ;;  %s982_s16 = sshra.s32 %s597_s1, 4  ;;  %s983_s16 = int_to_ptr.hbm [resolvable:$true] %s982_s16 }
  0x43   : > { %479 = vmatpush.msra.mxu1 %v472_v6  ;;  %v469_v11 = vld [vmem:[#allocation7 + $0x58] sm:$0xff]  ;;  %v425_v12 = vld [vmem:[#allocation5 + $0x40] sm:$0xff]  ;;  %v468_v13 = vld [vmem:[#allocation7 + $0x50] sm:$0xff]  ;;  %s984_s7 = scalar_lea.hbm %s983_s16, 8  ;;  %p989_p12 = scmp.lt.s32.totalorder %s983_s16, %s1295_s9 }
  0x44   : > { %439 = vmatpush.msra.mxu0 %v430_v2  ;;  %v424_v14 = vld [vmem:[#allocation5 + $0x38] sm:$0xff]  ;;  %v467_v15 = vld [vmem:[#allocation7 + $0x48] sm:$0xff]  ;;  %v423_v16 = vld [vmem:[#allocation5 + $0x30] sm:$0xff]  ;;  %p985_p1 = scmp.ne.s32.totalorder %s983_s16, %s984_s7  ;;  %p990_p7 = scmp.lt.s32.totalorder %s988_s28, %s984_s7 }
  0x45   : > { %480 = vmatpush.msra.mxu1 %v471_v7  ;;  %v466_v17 = vld [vmem:[#allocation7 + $0x40] sm:$0xff]  ;;  %v422_v18 = vld [vmem:[#allocation5 + $0x28] sm:$0xff]  ;;  %v465_v19 = vld [vmem:[#allocation7 + $0x38] sm:$0xff] }
  0x46   : > { %440 = vmatpush.msra.mxu0 %v429_v3  ;;  %v421_v20 = vld [vmem:[#allocation5 + $0x20] sm:$0xff]  ;;  %v464_v21 = vld [vmem:[#allocation7 + $0x30] sm:$0xff]  ;;  %v420_v22 = vld [vmem:[#allocation5 + $0x18] sm:$0xff]  ;;  %p986_p3 = pnand %p985_p1, %p1187_p4  ;;  %p991_p8 = por %p990_p7, %p989_p12 }
  0x47   : > { %481 = vmatpush.msra.mxu1 %v470_v9  ;;  %v463_v23 = vld [vmem:[#allocation7 + $0x28] sm:$0xff]  ;;  %v419_v24 = vld [vmem:[#allocation5 + $0x10] sm:$0xff]  ;;  %v462_v25 = vld [vmem:[#allocation7 + $0x20] sm:$0xff] }
  0x48   : > { %441 = vmatpush.msra.mxu0 %v428_v5  ;;  %v418_v26 = vld [vmem:[#allocation5 + $0x8] sm:$0xff]  ;;  %v461_v27 = vld [vmem:[#allocation7 + $0x18] sm:$0xff]  ;;  %v417_v28 = vld [vmem:[#allocation5] sm:$0xff]  ;;  %p987_p5 = pneg %p986_p3 }
  0x49   : > { %482 = vmatpush.msra.mxu1 %v469_v11  ;;  %v416_v29 = vld [vmem:[%s1224_s5] sm:$0xff]  ;;  %v459_v31 = vld [vmem:[#allocation7 + $0x8] sm:$0xff]  ;;  %v458_v32 = vld [vmem:[#allocation7] sm:$0xff]  ;;  %s594_s5 = sshll.u32 %s415_s27, 4  ;;  %s595_s5 = int_to_ptr.vmem [resolvable:$true] %s594_s5 }
  0x4a   : > { %442 = vmatpush.msra.mxu0 %v427_v8  ;;  %v460_v30 = vld [vmem:[#allocation7 + $0x10] sm:$0xff]  ;;  %v514_v33 = vld [vmem:[#allocation8 + $0x78] sm:$0xff]  ;;  %v512_v35 = vld [vmem:[#allocation8 + $0x68] sm:$0xff]  ;;  %p992_p9 = pnand %p991_p8, %p987_p5 }
  0x4b   : > { %483 = vmatpush.msra.mxu1 %v468_v13  ;;  %v513_v34 = vld [vmem:[#allocation8 + $0x70] sm:$0xff]  ;;  %519 = vmatpush.msra.mxu2 %v514_v33  ;;  %v511_v36 = vld [vmem:[#allocation8 + $0x60] sm:$0xff]  ;;  %v510_v37 = vld [vmem:[#allocation8 + $0x58] sm:$0xff] }
  0x4c   : > { %443 = vmatpush.msra.mxu0 %v426_v10  ;;  %v509_v38 = vld [vmem:[#allocation8 + $0x50] sm:$0xff]  ;;  %v508_v39 = vld [vmem:[#allocation8 + $0x48] sm:$0xff]  ;;  %v507_v40 = vld [vmem:[#allocation8 + $0x40] sm:$0xff] }
  0x4d   : > { %484 = vmatpush.msra.mxu1 %v467_v15  ;;  %520 = vmatpush.msra.mxu2 %v513_v34  ;;  %v506_v41 = vld [vmem:[#allocation8 + $0x38] sm:$0xff]  ;;  %v505_v42 = vld [vmem:[#allocation8 + $0x30] sm:$0xff]  ;;  %v504_v43 = vld [vmem:[#allocation8 + $0x28] sm:$0xff] }
  0x4e   : > { %444 = vmatpush.msra.mxu0 %v425_v12  ;;  %v503_v44 = vld [vmem:[#allocation8 + $0x20] sm:$0xff]  ;;  %v502_v45 = vld [vmem:[#allocation8 + $0x18] sm:$0xff]  ;;  %v814_v46 = vld [vmem:[%s1288_s2] ss:$0 sm:$0xff] }
  0x4f   : > { %485 = vmatpush.msra.mxu1 %v466_v17  ;;  %521 = vmatpush.msra.mxu2 %v512_v35  ;;  %v501_v50 = vld [vmem:[#allocation8 + $0x10] sm:$0xff]  ;;  %v500_v51 = vld [vmem:[#allocation8 + $0x8] sm:$0xff]  ;;  %v499_v52 = vld [vmem:[#allocation8] sm:$0xff] }
  0x50   : > { %445 = vmatpush.msra.mxu0 %v424_v14  ;;  %v555_v53 = vld [vmem:[#allocation10 + $0x78] sm:$0xff]  ;;  %v554_v54 = vld [vmem:[#allocation10 + $0x70] sm:$0xff]  ;;  %v553_v55 = vld [vmem:[#allocation10 + $0x68] sm:$0xff] }
  0x51   : > { %486 = vmatpush.msra.mxu1 %v465_v19  ;;  %522 = vmatpush.msra.mxu2 %v511_v36  ;;  %v552_v56 = vld [vmem:[#allocation10 + $0x60] sm:$0xff]  ;;  %v551_v57 = vld [vmem:[#allocation10 + $0x58] sm:$0xff]  ;;  %v550_v58 = vld [vmem:[#allocation10 + $0x50] sm:$0xff] }
  0x52   : > { %446 = vmatpush.msra.mxu0 %v423_v16  ;;  %560 = vmatpush.msra.mxu3 %v555_v53  ;;  %v549_v59 = vld [vmem:[#allocation10 + $0x48] sm:$0xff]  ;;  %v548_v60 = vld [vmem:[#allocation10 + $0x40] sm:$0xff]  ;;  %v547_v61 = vld [vmem:[#allocation10 + $0x38] sm:$0xff] }
  0x53   : > { %487 = vmatpush.msra.mxu1 %v464_v21  ;;  %523 = vmatpush.msra.mxu2 %v510_v37  ;;  %v546_v62 = vld [vmem:[#allocation10 + $0x30] sm:$0xff]  ;;  %v545_v63 = vld [vmem:[#allocation10 + $0x28] sm:$0xff]  ;;  %v544_v0 = vld [vmem:[#allocation10 + $0x20] sm:$0xff] }
  0x54   : > { %447 = vmatpush.msra.mxu0 %v422_v18  ;;  %561 = vmatpush.msra.mxu3 %v554_v54  ;;  %v543_v1 = vld [vmem:[#allocation10 + $0x18] sm:$0xff]  ;;  %v815_v2 = vld [vmem:[%s1290_s4] ss:$0 sm:$0xff]  ;;  %v541_v7 = vld [vmem:[#allocation10 + $0x8] sm:$0xff] }
  0x55   : > { %488 = vmatpush.msra.mxu1 %v463_v23  ;;  %524 = vmatpush.msra.mxu2 %v509_v38  ;;  %v542_v6 = vld [vmem:[#allocation10 + $0x10] sm:$0xff]  ;;  %v540_v8 = vld [vmem:[#allocation10] sm:$0xff] }
  0x56   : > { %448 = vmatpush.msra.mxu0 %v421_v20  ;;  %562 = vmatpush.msra.mxu3 %v553_v55  ;;  %v816_v9 = vld [vmem:[%s1292_s6] ss:$0 sm:$0xff] }
  0x57   : > { %489 = vmatpush.msra.mxu1 %v462_v25  ;;  %525 = vmatpush.msra.mxu2 %v508_v39  ;;  %v817_v13 = vld [vmem:[%s1294_s8] ss:$0 sm:$0xff] }
  0x58   : > { %449 = vmatpush.msra.mxu0 %v420_v22  ;;  %563 = vmatpush.msra.mxu3 %v552_v56 }
  0x59   : > { %490 = vmatpush.msra.mxu1 %v461_v27  ;;  %526 = vmatpush.msra.mxu2 %v507_v40 }
  0x5a   : > { %450 = vmatpush.msra.mxu0 %v419_v24  ;;  %564 = vmatpush.msra.mxu3 %v551_v57 }
  0x5b   : > { %491 = vmatpush.msra.mxu1 %v460_v30  ;;  %527 = vmatpush.msra.mxu2 %v506_v41 }
  0x5c   : > { %451 = vmatpush.msra.mxu0 %v418_v26  ;;  %565 = vmatpush.msra.mxu3 %v550_v58 }
  0x5d   : > { %492 = vmatpush.msra.mxu1 %v459_v31  ;;  %528 = vmatpush.msra.mxu2 %v505_v42 }
  0x5e   : > { %452 = vmatpush.msra.mxu0 %v417_v28  ;;  %566 = vmatpush.msra.mxu3 %v549_v59 }
  0x5f   : > { %453 = vmatmul.f32.vlgmr.msra.gmra.mxu0 %v416_v29  ;;  %493 = vmatpush.msra.mxu1 %v458_v32 }
  0x60   : > { %529 = vmatpush.msra.mxu2 %v504_v43  ;;  %567 = vmatpush.msra.mxu3 %v548_v60 }
  0x62   : > { %530 = vmatpush.msra.mxu2 %v503_v44  ;;  %568 = vmatpush.msra.mxu3 %v547_v61 }
  0x64   : > { %531 = vmatpush.msra.mxu2 %v502_v45  ;;  %569 = vmatpush.msra.mxu3 %v546_v62 }
  0x66   : > { %532 = vmatpush.msra.mxu2 %v501_v50  ;;  %570 = vmatpush.msra.mxu3 %v545_v63 }
  0x68   : > { %533 = vmatpush.msra.mxu2 %v500_v51  ;;  %571 = vmatpush.msra.mxu3 %v544_v0 }
  0x6a   : > { %534 = vmatpush.msra.mxu2 %v499_v52  ;;  %572 = vmatpush.msra.mxu3 %v543_v1 }
  0x6c   : > { %573 = vmatpush.msra.mxu3 %v542_v6 }
  0x6e   : > { %574 = vmatpush.msra.mxu3 %v541_v7 }
  0x70   : > { %575 = vmatpush.msra.mxu3 %v540_v8 }
  0xdc   : > { %v454_v47 = vpop.f32.mrf.mxu0 }
  0xdd   : > { %v455_v48 = vadd.f32 %v814_v46, %v454_v47 }
  0xdf   : > { %v457_v49 = vmax.f32 %v455_v48, 0.0 }
  0xe1   : > { %494 = vmatmul.f32.vlgmr.msra.gmra.mxu1 %v457_v49 }
 0x15e   : > { %v495_v3 = vpop.f32.mrf.mxu1 }
 0x15f   : > { %v496_v4 = vadd.f32 %v815_v2, %v495_v3 }
 0x161   : > { %v498_v5 = vmax.f32 %v496_v4, 0.0 }
 0x163   : > { %535 = vmatmul.f32.vlgmr.msra.gmra.mxu2 %v498_v5 }
 0x1e6   : > { %v536_v10 = vpop.f32.mrf.mxu2 }
 0x1e7   : > { %v537_v11 = vadd.f32 %v816_v9, %v536_v10 }
 0x1e9   : > { %v539_v12 = vmax.f32 %v537_v11, 0.0 }
 0x1eb   : > { %576 = vmatmul.f32.vlgmr.msra.gmra.mxu3 %v539_v12 }
 0x26e   : > { %v577_v14 = vpop.f32.mrf.mxu3 }
 0x26f   : > { %v578_v15 = vadd.f32 %v817_v13, %v577_v14 }
 0x271   : > { %580 = vst [vmem:[%s415_s27] sm:$0xff] %v578_v15 }
 0x272   : > { %995 = shalt.err (!%p992_p9)
}
 0x273   : > { %743 = dma.vmem_to_hbm [thread:$0]  (%p1187_p4), %s595_s5, 128, %s597_s1, %s582_s3  }
 0x274 PF: > { %s608_s29 = sand.u32 1, %s1030_s30   ;;  %p1311_p10 = scmp.ge.s32.totalorder %s1042_s12, 2 }
 0x275   : > { %s609_s20 = scalar_lea.sflag [#allocation4], %s608_s29 }
 0x276   : > { %p763_p13 = pnand %p1311_p10, %p1191_p6 }
 0x278   : > { %p764_p11 = pneg %p763_p13 }
 0x27a   : > { %1025 = dma.done.wait (%p764_p11), %s609_s20, 128  }
 0x27b   : > { %1027 = vsyncadd (%p764_p11), %s609_s20, 4294967168  ;;  %p24_p0 = scmp.ge.s32.totalorder %s1161_s25, 4   ;;  %s1312_s30 = smov %s1034_s10 }
 0x27c   : > { %s1313_s10 = smov %s1038_s11  ;;  %s1314_s11 = smov %s1172_s26 }
 0x27d   : > { %s1315_s12 = smov %s1161_s25  ;;  %26 = sbr.rel (!%p24_p0) target bundleno = 12 (0xc), region = 117 }
 0x282   :  { %615 = vsyncpa [#allocation3], 1 }
 0x283   :  { %617 = vsyncpa [#allocation3 + $0x1], 1 }
 0x284   :  { %618 = vsyncpa [#allocation6], 1 }
 0x285   :  { %619 = vsyncpa [#allocation9], 1 }
 0x286   :  { %620 = vsyncpa [#allocation4], 1 }
 0x287   :  { %622 = vsyncpa [#allocation4 + $0x1], 1 }

</bundles_post_ra>
